<compile_context>
chip_gen: v7x
topology: tpu7x:2x2x1
jax: 0.10.0
libtpu: 0.0.40
codegen_flags: <defaults>
</compile_context>

<pallas_src>
import functools
import math

import numpy as np

import jax
import jax.numpy as jnp
from jax import lax
from jax.experimental import pallas as pl
from jax.experimental.pallas import tpu as pltpu


def _conv_gn_mish_kernel(x_ref, w_ref, p_ref, o_ref, *, kernel_size, seq_len,
                         num_groups, eps, batch_tile, conv_dtype, exact_mish):
    """One grid step processes `batch_tile` batch elements packed along lanes.

    x_ref: (C_in,  Bt*L)     input; batch b occupies lanes [b*L, (b+1)*L)
    w_ref: (K, C_out, C_in)  conv weight (tap-major), conv_dtype
    p_ref: (3, C_out, 1)     [bias; gamma; beta], f32
    o_ref: (C_out, Bt*L)     output slab (lane-dense store)
    """
    C_in = x_ref.shape[0]
    C_out = o_ref.shape[0]
    K = kernel_size
    L = seq_len
    Bt = batch_tile
    BtL = Bt * L
    G = num_groups
    Cg = C_out // G
    pad = K // 2
    inv_cnt = 1.0 / float(Cg * L)

    bias_c = p_ref[0]      # (C_out, 1)
    gamma_c = p_ref[1]     # (C_out, 1)
    beta_c = p_ref[2]      # (C_out, 1)

    # ---- Conv1d: K accumulated matmuls on shifted views (single x copy) -----
    xc = x_ref[...].astype(conv_dtype)                        # (C_in, BtL)
    if pad > 0:
        zpad = jnp.zeros((C_in, pad), conv_dtype)
        xpadded = jnp.concatenate([zpad, xc, zpad], axis=1)   # (C_in, BtL+2*pad)
    else:
        xpadded = xc

    need_mask = (K > 1) and (Bt > 1)
    if need_mask:
        # position of each lane within its batch segment
        l_idx = lax.broadcasted_iota(jnp.int32, (C_in, BtL), 1) % L

    y = jnp.zeros((C_out, BtL), jnp.float32)
    for t in range(K):                                        # static -> unrolled
        shift = t - pad
        s_t = xpadded[:, t:t + BtL]
        if shift != 0 and need_mask:
            # zero lanes whose source crossed a batch-segment boundary
            mask = (l_idx >= -shift) if shift < 0 else (l_idx < L - shift)
            s_t = jnp.where(mask, s_t, jnp.zeros_like(s_t))
        y = y + jnp.dot(w_ref[t], s_t, preferred_element_type=jnp.float32)
    y = y + bias_c                                            # one f32 slab add

    # ---- GroupNorm: per-(batch, group) stats via tiny 0/1-matrix matmuls ----
    # Segment matrices: S (BtL, Bt) sums lanes per batch; ST broadcasts back.
    j_row = lax.broadcasted_iota(jnp.int32, (BtL, Bt), 0)
    b_col = lax.broadcasted_iota(jnp.int32, (BtL, Bt), 1) * L
    S = ((j_row >= b_col) & (j_row < b_col + L)).astype(jnp.float32)
    j_col = lax.broadcasted_iota(jnp.int32, (Bt, BtL), 1)
    b_row = lax.broadcasted_iota(jnp.int32, (Bt, BtL), 0) * L
    ST = ((j_col >= b_row) & (j_col < b_row + L)).astype(jnp.float32)
    # Group matrices: Gm (G, C_out) sums channels per group; GmT broadcasts back.
    c_col = lax.broadcasted_iota(jnp.int32, (G, C_out), 1)
    g_row = lax.broadcasted_iota(jnp.int32, (G, C_out), 0) * Cg
    Gm = ((c_col >= g_row) & (c_col < g_row + Cg)).astype(jnp.float32)
    c_row = lax.broadcasted_iota(jnp.int32, (C_out, G), 0)
    g_col = lax.broadcasted_iota(jnp.int32, (C_out, G), 1) * Cg
    GmT = ((c_row >= g_col) & (c_row < g_col + Cg)).astype(jnp.float32)

    sum_cb = jnp.dot(y, S, preferred_element_type=jnp.float32)              # (C_out, Bt)
    mean_gb = jnp.dot(Gm, sum_cb, preferred_element_type=jnp.float32) * inv_cnt
    mean_cb = jnp.dot(GmT, mean_gb, preferred_element_type=jnp.float32)     # (C_out, Bt)
    mean_full = jnp.dot(mean_cb, ST, preferred_element_type=jnp.float32)    # (C_out, BtL)

    d = y - mean_full                                   # centered two-pass variance
    ss_cb = jnp.dot(d * d, S, preferred_element_type=jnp.float32)
    var_gb = jnp.dot(Gm, ss_cb, preferred_element_type=jnp.float32) * inv_cnt
    inv_std_cb = jnp.dot(GmT, lax.rsqrt(var_gb + eps),
                         preferred_element_type=jnp.float32)                # (C_out, Bt)
    scale_full = jnp.dot(inv_std_cb * gamma_c, ST,
                         preferred_element_type=jnp.float32)                # (C_out, BtL)
    z = d * scale_full + beta_c

    # ---- Mish: z * tanh(softplus(z)); tanh(log1p(e)) = ((1+e)^2-1)/((1+e)^2+1)
    e = jnp.exp(jnp.minimum(z, 20.0))
    u2 = (1.0 + e) * (1.0 + e)
    if exact_mish:
        t_ = (u2 - 1.0) / (u2 + 1.0)
    else:
        t_ = (u2 - 1.0) * pl.reciprocal(u2 + 1.0, approx=True)
    o_ref[...] = jnp.where(z > 20.0, z, z * t_).astype(o_ref.dtype)


def conv1d_block(x, weight, bias, gamma, beta, *, num_groups, eps=1e-5,
                 conv_dtype=jnp.bfloat16, batch_tile=None):
    """x: (B, C_in, L); weight: (C_out, C_in, K); bias/gamma/beta: (C_out,)."""
    B, C_in, L = x.shape
    C_out, C_in_w, K = weight.shape
    assert C_in_w == C_in
    assert C_out % num_groups == 0, "GroupNorm needs C_out % num_groups == 0"
    # TODO(synk): even kernel_size (PyTorch 'same-ish' padding gives L+1 outputs)
    # needs a different packed layout; Conv1dBlock is used with odd K.
    assert K % 2 == 1, "only odd kernel_size supported by this kernel"

    # ---- choose how many batch elements to pack along the lane dim ----------
    if batch_tile is None:
        if L % 128 == 0:
            bt = 1
        else:
            bt = (128 * L) // math.gcd(128, L) // L   # smallest bt with bt*L % 128 == 0
        # Grow toward 256 lanes (v6e/v7x MXU width) while keeping >= 4 grid
        # steps so v7x's two TensorCores both get work on the "parallel" axis.
        while bt * L < 256 and B >= 4 * bt:
            bt *= 2
        batch_tile = bt
    Bp = pl.cdiv(B, batch_tile) * batch_tile          # pad batch; never shrink bt
    if (batch_tile * L) % 128 != 0:
        # fall back to one block covering the full lane extent (always legal)
        batch_tile = Bp
    # TODO(synk): very long L with large C_out needs an L-tile grid axis with
    # K-1 halos + accumulate/finalize GroupNorm stats; this targets short L.

    # ---- host-side layout ----------------------------------------------------
    if Bp != B:
        x = jnp.concatenate([x, jnp.zeros((Bp - B, C_in, L), x.dtype)], axis=0)
    xp = jnp.transpose(x, (1, 0, 2)).reshape(C_in, Bp * L)          # batch on lanes
    w_packed = jnp.transpose(weight, (2, 0, 1)).astype(conv_dtype)  # (K, C_out, C_in)
    params = jnp.stack([bias, gamma, beta], axis=0).astype(jnp.float32)
    params = params.reshape(3, C_out, 1)

    # ---- generation-aware VMEM budget ---------------------------------------
    try:
        vmem_cap = int(pltpu.get_tpu_info().vmem_capacity_bytes)
    except Exception:
        vmem_cap = 128 * 1024 * 1024
    vmem_limit = int(min(vmem_cap // 2, 64 * 1024 * 1024))  # ~32 MiB v7x, 64 MiB v5e/v6e

    kernel = functools.partial(
        _conv_gn_mish_kernel, kernel_size=K, seq_len=L, num_groups=num_groups,
        eps=float(eps), batch_tile=batch_tile, conv_dtype=conv_dtype,
        exact_mish=np.dtype(conv_dtype) == np.dtype(jnp.float32))

    # TODO(synk): mark the grid-invariant w_packed/params specs single-buffered
    # (pipeline_mode=pl.Buffered(1)) once that is honored by top-level
    # pallas_call; would free one weight-sized VMEM buffer on v7x.
    out = pl.pallas_call(
        kernel,
        out_shape=jax.ShapeDtypeStruct((C_out, Bp * L), x.dtype),
        grid_spec=pltpu.PrefetchScalarGridSpec(
            num_scalar_prefetch=0,
            grid=(Bp // batch_tile,),
            in_specs=[
                pl.BlockSpec((C_in, batch_tile * L), lambda i: (0, i)),
                pl.BlockSpec((K, C_out, C_in), lambda i: (0, 0, 0)),
                pl.BlockSpec((3, C_out, 1), lambda i: (0, 0, 0)),
            ],
            out_specs=pl.BlockSpec((C_out, batch_tile * L), lambda i: (0, i)),
        ),
        compiler_params=pltpu.CompilerParams(
            dimension_semantics=("parallel",),
            vmem_limit_bytes=vmem_limit),
    )(xp, w_packed, params)

    # lane-dense (C_out, Bp*L) -> (B, C_out, L); cheap wrapper-side reshape
    return out.reshape(C_out, Bp, L).transpose(1, 0, 2)[:B]


def _reference(x, weight, bias, gamma, beta, *, num_groups, eps=1e-5):
    """Pure-JAX reference matching PyTorch Conv1d + GroupNorm + Mish."""
    K = weight.shape[2]
    y = lax.conv_general_dilated(
        x, weight, window_strides=(1,), padding=[(K // 2, K // 2)],
        dimension_numbers=("NCH", "OIH", "NCH"))
    y = y + bias[None, :, None]
    B, C, L = y.shape
    yg = y.reshape(B, num_groups, C // num_groups, L)
    mean = yg.mean(axis=(2, 3), keepdims=True)
    var = yg.var(axis=(2, 3), keepdims=True)
    yn = ((yg - mean) / jnp.sqrt(var + eps)).reshape(B, C, L)
    z = yn * gamma[None, :, None] + beta[None, :, None]
    return z * jnp.tanh(jax.nn.softplus(z))


if __name__ == "__main__":
    B, C_in, C_out, L, K, G = 2, 4, 16, 16, 3, 8

    key = jax.random.PRNGKey(0)
    k1, k2, k3, k4, k5 = jax.random.split(key, 5)
    x = jax.random.normal(k1, (B, C_in, L), dtype=jnp.float32)
    weight = jax.random.normal(k2, (C_out, C_in, K), dtype=jnp.float32) * 0.3
    bias = jax.random.normal(k3, (C_out,), dtype=jnp.float32) * 0.1
    gamma = 1.0 + 0.1 * jax.random.normal(k4, (C_out,), dtype=jnp.float32)
    beta = 0.1 * jax.random.normal(k5, (C_out,), dtype=jnp.float32)

    ref = _reference(x, weight, bias, gamma, beta, num_groups=G)

    # Fast path: bf16 MXU inputs, f32 accumulation.
    out_bf16 = conv1d_block(x, weight, bias, gamma, beta, num_groups=G)
    out_bf16 = jax.block_until_ready(out_bf16)
    assert out_bf16.shape == (B, C_out, L), out_bf16.shape
    assert jnp.allclose(out_bf16, ref, atol=5e-2, rtol=5e-2), \
        float(jnp.max(jnp.abs(out_bf16 - ref)))

    # Full-precision path (exact Mish divide) for a tighter correctness check.
    out_f32 = conv1d_block(x, weight, bias, gamma, beta, num_groups=G,
                           conv_dtype=jnp.float32)
    out_f32 = jax.block_until_ready(out_f32)
    assert jnp.allclose(out_f32, ref, atol=1e-2, rtol=1e-2), \
        float(jnp.max(jnp.abs(out_f32 - ref)))

    print("KERNEL_OK")
</pallas_src>

<mosaic_0001>
module attributes {stable_mosaic.version = 11 : i64} {
  func.func @_conv_gn_mish_kernel(%arg0: i32, %arg1: memref<4x128xf32, #tpu.memory_space<vmem>>, %arg2: memref<3x16x4xbf16, #tpu.memory_space<vmem>>, %arg3: memref<3x16x1xf32, #tpu.memory_space<vmem>>, %arg4: memref<16x128xf32, #tpu.memory_space<vmem>>) attributes {dimension_semantics = [#tpu.dimension_semantics<parallel>], iteration_bounds = array<i64: 1>, scalar_prefetch = 0 : i64, scratch_operands = 0 : i64, tpu.core_type = #tpu.core_type<tc>, window_params = [{transform_indices = @transform_0, window_bounds = array<i64: 4, 128>}, {pipeline_mode = #tpu.pipeline_mode<synchronous>, transform_indices = @transform_1, window_bounds = array<i64: 3, 16, 4>}, {pipeline_mode = #tpu.pipeline_mode<synchronous>, transform_indices = @transform_2, window_bounds = array<i64: 3, 16, 1>}, {transform_indices = @transform_3, window_bounds = array<i64: 16, 128>}]} {
    %c0 = arith.constant 0 : index
    %c0_0 = arith.constant 0 : index
    %c0_1 = arith.constant 0 : index
    %0 = vector.load %arg3[%c0, %c0_0, %c0_1] : memref<3x16x1xf32, #tpu.memory_space<vmem>>, vector<1x16x1xf32>
    %1 = vector.shape_cast %0 : vector<1x16x1xf32> to vector<16x1xf32>
    %c1 = arith.constant 1 : index
    %c0_2 = arith.constant 0 : index
    %c0_3 = arith.constant 0 : index
    %2 = vector.load %arg3[%c1, %c0_2, %c0_3] : memref<3x16x1xf32, #tpu.memory_space<vmem>>, vector<1x16x1xf32>
    %3 = vector.shape_cast %2 : vector<1x16x1xf32> to vector<16x1xf32>
    %c2 = arith.constant 2 : index
    %c0_4 = arith.constant 0 : index
    %c0_5 = arith.constant 0 : index
    %4 = vector.load %arg3[%c2, %c0_4, %c0_5] : memref<3x16x1xf32, #tpu.memory_space<vmem>>, vector<1x16x1xf32>
    %5 = vector.shape_cast %4 : vector<1x16x1xf32> to vector<16x1xf32>
    %c0_6 = arith.constant 0 : index
    %c0_7 = arith.constant 0 : index
    %6 = vector.load %arg1[%c0_6, %c0_7] : memref<4x128xf32, #tpu.memory_space<vmem>>, vector<4x128xf32>
    %7 = arith.truncf %6 : vector<4x128xf32> to vector<4x128xbf16>
    %cst = arith.constant 0.000000e+00 : bf16
    %8 = vector.broadcast %cst : bf16 to vector<4x1xbf16>
    %9 = tpu.concatenate %8, %7, %8 in 1 : vector<4x1xbf16>, vector<4x128xbf16>, vector<4x1xbf16> -> vector<4x130xbf16>
    %10 = tpu.iota {dimensions = array<i32: 1>} : vector<4x128xi32>
    %c16_i32 = arith.constant 16 : i32
    %c0_i32 = arith.constant 0 : i32
    %11 = arith.cmpi eq, %c16_i32, %c0_i32 : i32
    %c1_i32 = arith.constant 1 : i32
    %12 = arith.select %11, %c1_i32, %c16_i32 : i32
    %13 = vector.broadcast %12 : i32 to vector<4x128xi32>
    %14 = arith.remsi %10, %13 : vector<4x128xi32>
    %c0_i32_8 = arith.constant 0 : i32
    %15 = vector.broadcast %c0_i32_8 : i32 to vector<4x128xi32>
    %16 = arith.cmpi ne, %14, %15 : vector<4x128xi32>
    %c0_i32_9 = arith.constant 0 : i32
    %17 = vector.broadcast %c0_i32_9 : i32 to vector<4x128xi32>
    %18 = arith.cmpi slt, %14, %17 : vector<4x128xi32>
    %c0_i32_10 = arith.constant 0 : i32
    %19 = arith.cmpi slt, %12, %c0_i32_10 : i32
    %20 = vector.broadcast %19 : i1 to vector<4x128xi1>
    %21 = vector.broadcast %20 : vector<4x128xi1> to vector<4x128xi1>
    %22 = arith.xori %18, %21 : vector<4x128xi1>
    %23 = arith.andi %22, %16 : vector<4x128xi1>
    %24 = vector.broadcast %12 : i32 to vector<4x128xi32>
    %25 = arith.addi %14, %24 : vector<4x128xi32>
    %26 = arith.select %23, %25, %14 : vector<4x128xi1>, vector<4x128xi32>
    %cst_11 = arith.constant 0.000000e+00 : f32
    %27 = vector.broadcast %cst_11 : f32 to vector<16x128xf32>
    %28 = vector.extract_strided_slice %9 {offsets = [0, 0], sizes = [4, 128], strides = [1, 1]} : vector<4x130xbf16> to vector<4x128xbf16>
    %c1_i32_12 = arith.constant 1 : i32
    %29 = vector.broadcast %c1_i32_12 : i32 to vector<4x128xi32>
    %30 = arith.cmpi sge, %26, %29 : vector<4x128xi32>
    %cst_13 = arith.constant 0.000000e+00 : bf16
    %31 = vector.broadcast %cst_13 : bf16 to vector<4x128xbf16>
    %32 = arith.select %30, %28, %31 : vector<4x128xi1>, vector<4x128xbf16>
    %c0_14 = arith.constant 0 : index
    %c0_15 = arith.constant 0 : index
    %c0_16 = arith.constant 0 : index
    %33 = vector.load %arg2[%c0_14, %c0_15, %c0_16] : memref<3x16x4xbf16, #tpu.memory_space<vmem>>, vector<1x16x4xbf16>
    %34 = vector.shape_cast %33 : vector<1x16x4xbf16> to vector<16x4xbf16>
    %cst_17 = arith.constant dense<0.000000e+00> : vector<16x128xf32>
    %35 = tpu.matmul %34, %32, %cst_17 {dimension_numbers = #tpu.dot_dimension_numbers<[1], [0], [0], [1], [0, 0, 1, 1], [], []>} : vector<16x4xbf16>, vector<4x128xbf16>, vector<16x128xf32> -> vector<16x128xf32>
    %36 = arith.addf %27, %35 : vector<16x128xf32>
    %37 = vector.extract_strided_slice %9 {offsets = [0, 1], sizes = [4, 128], strides = [1, 1]} : vector<4x130xbf16> to vector<4x128xbf16>
    %c1_18 = arith.constant 1 : index
    %c0_19 = arith.constant 0 : index
    %c0_20 = arith.constant 0 : index
    %38 = vector.load %arg2[%c1_18, %c0_19, %c0_20] : memref<3x16x4xbf16, #tpu.memory_space<vmem>>, vector<1x16x4xbf16>
    %39 = vector.shape_cast %38 : vector<1x16x4xbf16> to vector<16x4xbf16>
    %cst_21 = arith.constant dense<0.000000e+00> : vector<16x128xf32>
    %40 = tpu.matmul %39, %37, %cst_21 {dimension_numbers = #tpu.dot_dimension_numbers<[1], [0], [0], [1], [0, 0, 1, 1], [], []>} : vector<16x4xbf16>, vector<4x128xbf16>, vector<16x128xf32> -> vector<16x128xf32>
    %41 = arith.addf %36, %40 : vector<16x128xf32>
    %42 = vector.extract_strided_slice %9 {offsets = [0, 2], sizes = [4, 128], strides = [1, 1]} : vector<4x130xbf16> to vector<4x128xbf16>
    %c15_i32 = arith.constant 15 : i32
    %43 = vector.broadcast %c15_i32 : i32 to vector<4x128xi32>
    %44 = arith.cmpi slt, %26, %43 : vector<4x128xi32>
    %cst_22 = arith.constant 0.000000e+00 : bf16
    %45 = vector.broadcast %cst_22 : bf16 to vector<4x128xbf16>
    %46 = arith.select %44, %42, %45 : vector<4x128xi1>, vector<4x128xbf16>
    %c2_23 = arith.constant 2 : index
    %c0_24 = arith.constant 0 : index
    %c0_25 = arith.constant 0 : index
    %47 = vector.load %arg2[%c2_23, %c0_24, %c0_25] : memref<3x16x4xbf16, #tpu.memory_space<vmem>>, vector<1x16x4xbf16>
    %48 = vector.shape_cast %47 : vector<1x16x4xbf16> to vector<16x4xbf16>
    %cst_26 = arith.constant dense<0.000000e+00> : vector<16x128xf32>
    %49 = tpu.matmul %48, %46, %cst_26 {dimension_numbers = #tpu.dot_dimension_numbers<[1], [0], [0], [1], [0, 0, 1, 1], [], []>} : vector<16x4xbf16>, vector<4x128xbf16>, vector<16x128xf32> -> vector<16x128xf32>
    %50 = arith.addf %41, %49 : vector<16x128xf32>
    %51 = vector.broadcast %1 : vector<16x1xf32> to vector<16x128xf32>
    %52 = arith.addf %50, %51 : vector<16x128xf32>
    %53 = tpu.iota {dimensions = array<i32: 0>} : vector<128x8xi32>
    %54 = tpu.iota {dimensions = array<i32: 1>} : vector<128x8xi32>
    %c16_i32_27 = arith.constant 16 : i32
    %55 = vector.broadcast %c16_i32_27 : i32 to vector<128x8xi32>
    %56 = arith.muli %54, %55 : vector<128x8xi32>
    %57 = arith.cmpi sge, %53, %56 : vector<128x8xi32>
    %c16_i32_28 = arith.constant 16 : i32
    %58 = vector.broadcast %c16_i32_28 : i32 to vector<128x8xi32>
    %59 = arith.addi %56, %58 : vector<128x8xi32>
    %60 = arith.cmpi slt, %53, %59 : vector<128x8xi32>
    %61 = arith.andi %57, %60 : vector<128x8xi1>
    %62 = arith.extui %61 : vector<128x8xi1> to vector<128x8xi32>
    %63 = arith.sitofp %62 : vector<128x8xi32> to vector<128x8xf32>
    %64 = tpu.iota {dimensions = array<i32: 1>} : vector<8x128xi32>
    %65 = tpu.iota {dimensions = array<i32: 0>} : vector<8x128xi32>
    %c16_i32_29 = arith.constant 16 : i32
    %66 = vector.broadcast %c16_i32_29 : i32 to vector<8x128xi32>
    %67 = arith.muli %65, %66 : vector<8x128xi32>
    %68 = arith.cmpi sge, %64, %67 : vector<8x128xi32>
    %c16_i32_30 = arith.constant 16 : i32
    %69 = vector.broadcast %c16_i32_30 : i32 to vector<8x128xi32>
    %70 = arith.addi %67, %69 : vector<8x128xi32>
    %71 = arith.cmpi slt, %64, %70 : vector<8x128xi32>
    %72 = arith.andi %68, %71 : vector<8x128xi1>
    %73 = arith.extui %72 : vector<8x128xi1> to vector<8x128xi32>
    %74 = arith.sitofp %73 : vector<8x128xi32> to vector<8x128xf32>
    %75 = tpu.iota {dimensions = array<i32: 1>} : vector<8x16xi32>
    %76 = tpu.iota {dimensions = array<i32: 0>} : vector<8x16xi32>
    %c2_i32 = arith.constant 2 : i32
    %77 = vector.broadcast %c2_i32 : i32 to vector<8x16xi32>
    %78 = arith.muli %76, %77 : vector<8x16xi32>
    %79 = arith.cmpi sge, %75, %78 : vector<8x16xi32>
    %c2_i32_31 = arith.constant 2 : i32
    %80 = vector.broadcast %c2_i32_31 : i32 to vector<8x16xi32>
    %81 = arith.addi %78, %80 : vector<8x16xi32>
    %82 = arith.cmpi slt, %75, %81 : vector<8x16xi32>
    %83 = arith.andi %79, %82 : vector<8x16xi1>
    %84 = arith.extui %83 : vector<8x16xi1> to vector<8x16xi32>
    %85 = arith.sitofp %84 : vector<8x16xi32> to vector<8x16xf32>
    %86 = tpu.iota {dimensions = array<i32: 0>} : vector<16x8xi32>
    %87 = tpu.iota {dimensions = array<i32: 1>} : vector<16x8xi32>
    %c2_i32_32 = arith.constant 2 : i32
    %88 = vector.broadcast %c2_i32_32 : i32 to vector<16x8xi32>
    %89 = arith.muli %87, %88 : vector<16x8xi32>
    %90 = arith.cmpi sge, %86, %89 : vector<16x8xi32>
    %c2_i32_33 = arith.constant 2 : i32
    %91 = vector.broadcast %c2_i32_33 : i32 to vector<16x8xi32>
    %92 = arith.addi %89, %91 : vector<16x8xi32>
    %93 = arith.cmpi slt, %86, %92 : vector<16x8xi32>
    %94 = arith.andi %90, %93 : vector<16x8xi1>
    %95 = arith.extui %94 : vector<16x8xi1> to vector<16x8xi32>
    %96 = arith.sitofp %95 : vector<16x8xi32> to vector<16x8xf32>
    %cst_34 = arith.constant dense<0.000000e+00> : vector<16x8xf32>
    %97 = tpu.matmul %52, %63, %cst_34 {dimension_numbers = #tpu.dot_dimension_numbers<[1], [0], [0], [1], [0, 0, 1, 1], [], []>} : vector<16x128xf32>, vector<128x8xf32>, vector<16x8xf32> -> vector<16x8xf32>
    %cst_35 = arith.constant dense<0.000000e+00> : vector<8x8xf32>
    %98 = tpu.matmul %85, %97, %cst_35 {dimension_numbers = #tpu.dot_dimension_numbers<[1], [0], [0], [1], [0, 0, 1, 1], [], []>} : vector<8x16xf32>, vector<16x8xf32>, vector<8x8xf32> -> vector<8x8xf32>
    %cst_36 = arith.constant 3.125000e-02 : f32
    %99 = vector.broadcast %cst_36 : f32 to vector<8x8xf32>
    %100 = arith.mulf %98, %99 : vector<8x8xf32>
    %cst_37 = arith.constant dense<0.000000e+00> : vector<16x8xf32>
    %101 = tpu.matmul %96, %100, %cst_37 {dimension_numbers = #tpu.dot_dimension_numbers<[1], [0], [0], [1], [0, 0, 1, 1], [], []>} : vector<16x8xf32>, vector<8x8xf32>, vector<16x8xf32> -> vector<16x8xf32>
    %cst_38 = arith.constant dense<0.000000e+00> : vector<16x128xf32>
    %102 = tpu.matmul %101, %74, %cst_38 {dimension_numbers = #tpu.dot_dimension_numbers<[1], [0], [0], [1], [0, 0, 1, 1], [], []>} : vector<16x8xf32>, vector<8x128xf32>, vector<16x128xf32> -> vector<16x128xf32>
    %103 = arith.subf %52, %102 : vector<16x128xf32>
    %104 = arith.mulf %103, %103 : vector<16x128xf32>
    %cst_39 = arith.constant dense<0.000000e+00> : vector<16x8xf32>
    %105 = tpu.matmul %104, %63, %cst_39 {dimension_numbers = #tpu.dot_dimension_numbers<[1], [0], [0], [1], [0, 0, 1, 1], [], []>} : vector<16x128xf32>, vector<128x8xf32>, vector<16x8xf32> -> vector<16x8xf32>
    %cst_40 = arith.constant dense<0.000000e+00> : vector<8x8xf32>
    %106 = tpu.matmul %85, %105, %cst_40 {dimension_numbers = #tpu.dot_dimension_numbers<[1], [0], [0], [1], [0, 0, 1, 1], [], []>} : vector<8x16xf32>, vector<16x8xf32>, vector<8x8xf32> -> vector<8x8xf32>
    %cst_41 = arith.constant 3.125000e-02 : f32
    %107 = vector.broadcast %cst_41 : f32 to vector<8x8xf32>
    %108 = arith.mulf %106, %107 : vector<8x8xf32>
    %cst_42 = arith.constant 9.99999974E-6 : f32
    %109 = vector.broadcast %cst_42 : f32 to vector<8x8xf32>
    %110 = arith.addf %108, %109 : vector<8x8xf32>
    %111 = math.rsqrt %110 : vector<8x8xf32>
    %cst_43 = arith.constant dense<0.000000e+00> : vector<16x8xf32>
    %112 = tpu.matmul %96, %111, %cst_43 {dimension_numbers = #tpu.dot_dimension_numbers<[1], [0], [0], [1], [0, 0, 1, 1], [], []>} : vector<16x8xf32>, vector<8x8xf32>, vector<16x8xf32> -> vector<16x8xf32>
    %113 = vector.broadcast %3 : vector<16x1xf32> to vector<16x8xf32>
    %114 = arith.mulf %112, %113 : vector<16x8xf32>
    %cst_44 = arith.constant dense<0.000000e+00> : vector<16x128xf32>
    %115 = tpu.matmul %114, %74, %cst_44 {dimension_numbers = #tpu.dot_dimension_numbers<[1], [0], [0], [1], [0, 0, 1, 1], [], []>} : vector<16x8xf32>, vector<8x128xf32>, vector<16x128xf32> -> vector<16x128xf32>
    %116 = arith.mulf %103, %115 : vector<16x128xf32>
    %117 = vector.broadcast %5 : vector<16x1xf32> to vector<16x128xf32>
    %118 = arith.addf %116, %117 : vector<16x128xf32>
    %cst_45 = arith.constant 2.000000e+01 : f32
    %119 = vector.broadcast %cst_45 : f32 to vector<16x128xf32>
    %120 = arith.minimumf %118, %119 : vector<16x128xf32>
    %121 = math.exp %120 : vector<16x128xf32>
    %cst_46 = arith.constant 1.000000e+00 : f32
    %122 = vector.broadcast %cst_46 : f32 to vector<16x128xf32>
    %123 = arith.addf %122, %121 : vector<16x128xf32>
    %cst_47 = arith.constant 1.000000e+00 : f32
    %124 = vector.broadcast %cst_47 : f32 to vector<16x128xf32>
    %125 = arith.addf %124, %121 : vector<16x128xf32>
    %126 = arith.mulf %123, %125 : vector<16x128xf32>
    %cst_48 = arith.constant 1.000000e+00 : f32
    %127 = vector.broadcast %cst_48 : f32 to vector<16x128xf32>
    %128 = arith.subf %126, %127 : vector<16x128xf32>
    %cst_49 = arith.constant 1.000000e+00 : f32
    %129 = vector.broadcast %cst_49 : f32 to vector<16x128xf32>
    %130 = arith.addf %126, %129 : vector<16x128xf32>
    %131 = tpu.reciprocal %130 {approx = true} : vector<16x128xf32> -> vector<16x128xf32>
    %132 = arith.mulf %128, %131 : vector<16x128xf32>
    %cst_50 = arith.constant 2.000000e+01 : f32
    %133 = vector.broadcast %cst_50 : f32 to vector<16x128xf32>
    %134 = arith.cmpf ogt, %118, %133 : vector<16x128xf32>
    %135 = arith.mulf %118, %132 : vector<16x128xf32>
    %136 = arith.select %134, %118, %135 : vector<16x128xi1>, vector<16x128xf32>
    %c0_51 = arith.constant 0 : index
    %c0_52 = arith.constant 0 : index
    %137 = vector.load %arg4[%c0_51, %c0_52] : memref<16x128xf32, #tpu.memory_space<vmem>>, vector<16x128xf32>
    tpu.vector_store %arg4[%c0_51, %c0_52], %136 {strides = array<i32>} : memref<16x128xf32, #tpu.memory_space<vmem>>, vector<16x128xf32>,
    return
  }
  func.func @transform_0(%arg0: i32) -> (i32, i32) {
    %c0_i32 = arith.constant 0 : i32
    %c0_i32_0 = arith.constant 0 : i32
    return %c0_i32, %arg0 : i32, i32
  }
  func.func @transform_1(%arg0: i32) -> (i32, i32, i32) {
    %c0_i32 = arith.constant 0 : i32
    %c0_i32_0 = arith.constant 0 : i32
    %c0_i32_1 = arith.constant 0 : i32
    %c0_i32_2 = arith.constant 0 : i32
    return %c0_i32, %c0_i32_0, %c0_i32_1 : i32, i32, i32
  }
  func.func @transform_2(%arg0: i32) -> (i32, i32, i32) {
    %c0_i32 = arith.constant 0 : i32
    %c0_i32_0 = arith.constant 0 : i32
    %c0_i32_1 = arith.constant 0 : i32
    %c0_i32_2 = arith.constant 0 : i32
    return %c0_i32, %c0_i32_0, %c0_i32_1 : i32, i32, i32
  }
  func.func @transform_3(%arg0: i32) -> (i32, i32) {
    %c0_i32 = arith.constant 0 : i32
    %c0_i32_0 = arith.constant 0 : i32
    return %c0_i32, %arg0 : i32, i32
  }
}

</mosaic_0001>

<bundles_post_ra>
// kernel: tpu_custom_call.1
= control target key start
LH: loop header
LB: loop body
LE: loop exit
PB: predicated region body
PF: predicated region fallthrough
CT: control target
= control target key end

     0   :  { %8 = vsyncpa [#allocation3], 0  ;;  %s1917_s0 = inlined_call_operand.hbm [shape: f32[4,128], index: 0, kind: input, shape index: {}]   ;;  %s1918_s1 = inlined_call_operand.hbm [shape: bf16[3,16,4], index: 1, kind: input, shape index: {}]   ;;  %s1919_s2 = inlined_call_operand.hbm [shape: f32[3,16,1], index: 2, kind: input, shape index: {}]   ;;  %s1920_s3 = inlined_call_operand.hbm [shape: f32[16,128], index: 3, kind: output, shape index: {}]  }
   0x1   :  { %9 = vsyncpa [#allocation6], 0 }
   0x2   :  { %10 = vsyncpa [#allocation4], 0  ;;  %s1569_s12 = smov [#allocation5]   ;;  %s1475_s16 = scalar_lea.hbm %s1918_s1, 384 }
   0x3   :  { %s26_s13 = sshll.u32 %s1569_s12, 4  ;;  %p1476_p0 = scmp.ne.s32.totalorder %s1918_s1, %s1475_s16  ;;  %s27_s13 = int_to_ptr.vmem [resolvable:$true] %s26_s13 }
   0x4   :  { %p1479_p1 = scmp.lt.u32.totalorder %s1475_s16, %s1918_s1 }
   0x6   :  { %p1481_p2 = pnand %p1479_p1, %p1476_p0 }
   0x8   :  { %1484 = shalt.err (!%p1481_p2)
}
   0x9   :  { %s1485_s21 = scalar_lea.vmem %s27_s13, 384  ;;  %p1490_p4 = scmp.lt.s32.totalorder %s27_s13, %s27_s13 }
   0xa   :  { %p1486_p3 = scmp.ne.s32.totalorder %s27_s13, %s1485_s21  ;;  %p1491_p5 = scmp.lt.s32.totalorder %s1485_s21, %s1485_s21 }
   0xc   :  { %p1492_p6 = por %p1491_p5, %p1490_p4 }
   0xe   :  { %p1493_p7 = pnand %p1492_p6, %p1486_p3 }
  0x10   :  { %1496 = shalt.err (!%p1493_p7)
}
  0x11   :  { %s1570_s22 = smov 64   ;;  %s1571_s23 = smov 4  }
  0x12   :  { %32 = dma.hbm_to_vmem [thread:$0]  %s1918_s1, 384, %s27_s13, [#allocation6], %s1570_s22, %s1570_s22, %s1571_s23  }
  0x13   :  { %s1572_s26 = smov [#allocation2]   ;;  %s1573_s28 = smov [#allocation7]  }
  0x14   :  { %s17_s27 = sshll.u32 %s1572_s26, 4  ;;  %s38_s29 = sshll.u32 %s1573_s28, 4  ;;  %s18_s27 = int_to_ptr.vmem [resolvable:$true] %s17_s27  ;;  %s39_s29 = int_to_ptr.vmem [resolvable:$true] %s38_s29 }
  0x15   :  { %s1497_s5 = scalar_lea.hbm %s1917_s0, 64 }
  0x16   :  { %p1498_p8 = scmp.ne.s32.totalorder %s1917_s0, %s1497_s5  ;;  %p1501_p9 = scmp.lt.u32.totalorder %s1497_s5, %s1917_s0 }
  0x18   :  { %p1503_p10 = pnand %p1501_p9, %p1498_p8 }
  0x1a   :  { %1506 = shalt.err (!%p1503_p10)
}
  0x1b   :  { %s1507_s1 = scalar_lea.vmem %s18_s27, 64  ;;  %p1512_p12 = scmp.lt.s32.totalorder %s18_s27, %s18_s27 }
  0x1c   :  { %p1508_p11 = scmp.ne.s32.totalorder %s18_s27, %s1507_s1  ;;  %p1513_p13 = scmp.lt.s32.totalorder %s1507_s1, %s1507_s1 }
  0x1e   :  { %p1514_p0 = por %p1513_p13, %p1512_p12 }
  0x20   :  { %p1515_p1 = pnand %p1514_p0, %p1508_p11 }
  0x22   :  { %1518 = shalt.err (!%p1515_p1)
}
  0x23   :  { %20 = dma.hbm_to_vmem [thread:$0]  %s1917_s0, 64, %s18_s27, [#allocation3]  }
  0x24   :  { %s1519_s14 = scalar_lea.hbm %s1919_s2, 768 }
  0x25   :  { %p1520_p2 = scmp.ne.s32.totalorder %s1919_s2, %s1519_s14  ;;  %p1523_p3 = scmp.lt.u32.totalorder %s1519_s14, %s1919_s2 }
  0x27   :  { %p1525_p4 = pnand %p1523_p3, %p1520_p2 }
  0x29   :  { %1528 = shalt.err (!%p1525_p4)
}
  0x2a   :  { %s1529_s19 = scalar_lea.vmem %s39_s29, 768  ;;  %p1534_p6 = scmp.lt.s32.totalorder %s39_s29, %s39_s29 }
  0x2b   :  { %p1530_p5 = scmp.ne.s32.totalorder %s39_s29, %s1529_s19  ;;  %p1535_p7 = scmp.lt.s32.totalorder %s1529_s19, %s1529_s19 }
  0x2d   :  { %p1536_p8 = por %p1535_p7, %p1534_p6 }
  0x2f   :  { %p1537_p9 = pnand %p1536_p8, %p1530_p5 }
  0x31   :  { %1540 = shalt.err (!%p1537_p9)
}
  0x32   :  { %s1574_s0 = smov 128   ;;  %s1575_s20 = smov 8  }
  0x33   :  { %44 = dma.hbm_to_vmem [thread:$0]  %s1919_s2, 768, %s39_s29, [#allocation6], %s1574_s0, %s1574_s0, %s1575_s20  }
  0x34   :  { %1563 = dma.done.wait [#allocation3], 64  }
  0x35   :  { %1564 = vsyncadd [#allocation3], 4294967232 }
  0x36   :  { %1565 = dma.done.wait [#allocation6], 1152  }
  0x37   :  { %1566 = vsyncadd [#allocation6], 4294966144  ;;  %v77_v0 = vlaneseq  ;;  %v1576_v1 = vmov 0   ;;  %v65_v6 = vld [vmem:[#allocation2] sm:$0xf]  ;;  %s1577_s2 = smov 1  }
  0x38   :  { %1460 = vset.pattern.permute.xlu0 %v1576_v1  ;;  %1461 = vset.pattern.permute.xlu1 %v1576_v1  ;;  %v66_v7 = vpack.c.bf16 %v65_v6, %v65_v6  ;;  %s1578_s23 = smov 2   ;;  %v1579_v10 = vmov 0.0   ;;  %vm1921_vm3 = vmmov 0   ;;  %vm70_vm4 = vcmask 7168   ;;  %s1581_s24 = smov 127   ;;  %v57_v17 = vld [vmem:[#allocation7] sm:$0xff] }
  0x39   :  { %v1646_v2 = vand.u32 127, %v77_v0  ;;  %v1648_v3 = vshrl.u32 %v77_v0, 7  ;;  %1250 = vmatprep.subr.bf16.mxu1 %v1579_v10  ;;  %1262 = vmatprep.subr.bf16.mxu0 %v1579_v10  ;;  %s1582_s25 = smov 126   ;;  %v58_v19 = vld [vmem:[#allocation7 + $0x8] sm:$0xff]  ;;  %v61_v20 = vld [vmem:[#allocation7 + $0x18] sm:$0xff]  ;;  %v60_v21 = vld [vmem:[#allocation7 + $0x10] sm:$0xff] }
  0x3a   :  { %68 = vrot.lane.b32.xlu0 %v66_v7, %s1577_s2  ;;  %1252 = vmatprep.mubr.msk.bf16.mxu1 %vm1921_vm3, %v1579_v10  ;;  %v64_v22 = vld [vmem:[#allocation7 + $0x28] sm:$0xff]  ;;  %v63_v23 = vld [vmem:[#allocation7 + $0x20] sm:$0xff]  ;;  %vm110_vm7 = vcmask 1039360   ;;  %vm116_vm12 = vcmask 1041408   ;;  %v1462_v33 = vld [vmem:[#allocation5 + $0x8] sm:$0xff]   ;;  %vm239_vm14 = vcmask 1031168  }
  0x3b   :  { %v83_v4 = vand.u32 15, %v1646_v2  ;;  %v218_v5 = vsub.s32 0, %v1648_v3  ;;  %1264 = vmatprep.mubr.msk.bf16.mxu0 %vm1921_vm3, %v1579_v10  ;;  %v1659_v24 = vmul.u32 16, %v1646_v2  ;;  %v1665_v26 = vadd.s32 8, %v1648_v3  ;;  %v1463_v41 = vld [vmem:[#allocation5 + $0x10] sm:$0xff]   ;;  %v1464_v44 = vld [vmem:[#allocation5] sm:$0xff]  }
  0x3c   :  { %v305_v29 = vadd.s32 16, %v1648_v3  ;;  %v306_v31 = vadd.s32 24, %v1648_v3  ;;  %v307_v38 = vadd.s32 32, %v1648_v3  ;;  %v308_v42 = vadd.s32 40, %v1648_v3  ;;  %s1586_s26 = smov [#allocation8]  }
  0x3d   :  { %vm213_vm0 = vcmp.lt.s32.totalorder %v83_v4, 15  ;;  %vm91_vm2 = vcmp.ge.s32.totalorder %v83_v4, 1  ;;  %v1662_v25 = vadd.s32 16, %v1659_v24  ;;  %vm320_vm8 = vcmp.ge.s32.totalorder %v1648_v3, %v1659_v24  ;;  %s1105_s27 = sshll.u32 %s1586_s26, 4  ;;  %s1106_s27 = int_to_ptr.vmem [resolvable:$true] %s1105_s27 }
  0x3e   :  { %vm214_vm1 = vmpackc.low %vm213_vm0, %vm213_vm0  ;;  %vm321_vm10 = vcmp.ge.s32.totalorder %v1665_v26, %v1659_v24  ;;  %vm112_vm0 = vcmask 31744   ;;  %v1583_v43 = vmov 1.0|1.0   ;;  %v309_v45 = vadd.s32 48, %v1648_v3  ;;  %s1541_s28 = scalar_lea.vmem %s1106_s27, 256  ;;  %p1546_p11 = scmp.lt.s32.totalorder %s1106_s27, %s1106_s27 }
  0x3f   :  { %v215_v8 = vsel %vm214_vm1, 65537, %v1576_v1  ;;  %vm92_vm5 = vmpackc.low %vm91_vm2, %vm91_vm2  ;;  %vm337_vm9 = vcmp.lt.s32.totalorder %v1648_v3, %v1662_v25  ;;  %vm338_vm11 = vcmp.lt.s32.totalorder %v1665_v26, %v1662_v25  ;;  %vm322_vm1 = vcmp.ge.s32.totalorder %v305_v29, %v1659_v24  ;;  %p1542_p10 = scmp.ne.s32.totalorder %s1106_s27, %s1541_s28  ;;  %p1547_p12 = scmp.lt.s32.totalorder %s1541_s28, %s1541_s28 }
  0x40   :  { %v219_v9 = vrot.slane %v215_v8, %v218_v5  ;;  %vm353_vm13 = vmand %vm320_vm8, %vm337_vm9  ;;  %vm339_vm2 = vcmp.lt.s32.totalorder %v305_v29, %v1662_v25  ;;  %vm324_vm9 = vcmp.ge.s32.totalorder %v307_v38, %v1659_v24  ;;  %v310_v47 = vadd.s32 56, %v1648_v3 }
  0x41   :  { %vm354_vm15 = vmand %vm321_vm10, %vm338_vm11  ;;  %vm341_vm10 = vcmp.lt.s32.totalorder %v307_v38, %v1662_v25  ;;  %vm325_vm11 = vcmp.ge.s32.totalorder %v308_v42, %v1659_v24  ;;  %v311_v50 = vadd.s32 64, %v1648_v3  ;;  %v312_v51 = vadd.s32 72, %v1648_v3  ;;  %p1548_p13 = por %p1547_p12, %p1546_p11 }
  0x42   :  { %220 = vrot.lane.b32.xlu0 %v219_v9, %s1578_s23  ;;  %v313_v52 = vadd.s32 80, %v1648_v3  ;;  %v314_v53 = vadd.s32 88, %v1648_v3  ;;  %v315_v55 = vadd.s32 96, %v1648_v3  ;;  %v316_v56 = vadd.s32 104, %v1648_v3 }
  0x43   :  { %v317_v58 = vadd.s32 112, %v1648_v3  ;;  %v318_v59 = vadd.s32 120, %v1648_v3  ;;  %v1938_v61 = vmov 0  ;;  %v415_v29 = vmul.u32 2, %v1646_v2  ;;  %p1549_p0 = pnand %p1548_p13, %p1542_p10 }
  0xac   :  { %v69_v11 = vpop.permute.xlu0 %68 }
  0xad   :  { %v73_v12 = vsel %vm70_vm4, 0, %v69_v11  ;;  %v75_v15 = vsel %vm70_vm4, %v69_v11, 0  ;;  %vm1681_vm4 = vmpackc.low %vm354_vm15, %vm353_vm13 }
  0xae   :  { %106 = vrot.lane.b32.xlu1 %v73_v12, %s1581_s24  ;;  %v93_v13 = vsel %vm92_vm5, %v73_v12, 0  ;;  %vm323_vm5 = vcmp.ge.s32.totalorder %v306_v31, %v1659_v24 }
  0xaf   :  { %v170_v39 = vsel %vm116_vm12, %v93_v13, 0 }
  0xb2   :  { %108 = vrot.lane.b32.xlu1 %v75_v15, %s1581_s24 }
  0xb4   :  { %v221_v14 = vpop.permute.xlu0 %220 }
  0xb5   :  { %vm222_vm6 = vcmp.ne.s16.totalorder %v221_v14, 0 }
  0xb6   :  { %v223_v16 = vsel %vm222_vm6, %v73_v12, 0  ;;  %v224_v18 = vsel %vm222_vm6, %v75_v15, 0  ;;  %vm340_vm6 = vcmp.lt.s32.totalorder %v306_v31, %v1662_v25 }
  0xb7   :  { %235 = vrot.lane.b32.xlu0 %v223_v16, %s1582_s25  ;;  %237 = vrot.lane.b32.xlu1 %v224_v18, %s1582_s25  ;;  %vm356_vm8 = vmand %vm323_vm5, %vm340_vm6  ;;  %vm327_vm5 = vcmp.ge.s32.totalorder %v310_v47, %v1659_v24  ;;  %vm344_vm6 = vcmp.lt.s32.totalorder %v310_v47, %v1662_v25 }
  0xbb   :  { %292 = vperm.xlu0 %1460, %v57_v17   ;;  %297 = vperm.xlu1 %1461, %v58_v19  }
  0xbf   :  { %974 = vperm.xlu0 %1460, %v61_v20   ;;  %969 = vperm.xlu1 %1461, %v60_v21   ;;  %v1584_v21 = vmov 0.0|0.0  }
  0xc3   :  { %1069 = vperm.xlu0 %1460, %v64_v22   ;;  %1064 = vperm.xlu1 %1461, %v63_v23   ;;  %v408_v22 = vmul.u32 2, %v1648_v3 }
  0xc5   :  { %v410_v23 = vadd.s32 2, %v408_v22 }
 0x120   :  { %v107_v27 = vpop.permute.xlu1 %106 }
 0x124   :  { %v109_v28 = vpop.permute.xlu1 %108 }
 0x125   :  { %v111_v30 = vsel %vm110_vm7, %v107_v27, %v109_v28  ;;  %vm355_vm7 = vmand %vm322_vm1, %vm339_vm2  ;;  %vm326_vm1 = vcmp.ge.s32.totalorder %v309_v45, %v1659_v24  ;;  %vm343_vm2 = vcmp.lt.s32.totalorder %v309_v45, %v1662_v25 }
 0x126   :  { %v118_v32 = vsel %vm116_vm12, %v111_v30, 0  ;;  %vm1703_vm13 = vmpackc.low %vm356_vm8, %vm355_vm7  ;;  %v418_v30 = vadd.s32 2, %v415_v29 }
 0x127   :  { %1251 = vmatpush3.bf16.msra.mxu1 %v118_v32  ;;  %vm360_vm8 = vmand %vm327_vm5, %vm344_vm6  ;;  %vm330_vm5 = vcmp.ge.s32.totalorder %v313_v52, %v1659_v24  ;;  %vm331_vm6 = vcmp.ge.s32.totalorder %v314_v53, %v1659_v24 }
 0x128   :  { %1256 = vmatprep.subr.bf16.mxu1 %v1579_v10 }
 0x129   :  { %v236_v34 = vpop.permute.xlu0 %235  ;;  %v238_v35 = vpop.permute.xlu1 %237 }
 0x12a   :  { %v240_v36 = vsel %vm239_vm14, %v236_v34, %v238_v35  ;;  %1253 = vmatmul.mubr.msk.bf16.vlgmr.msra.gmra.mrb[0].mxu1 %vm112_vm0, %v1462_v33  ;;  %vm357_vm14 = vmand %vm324_vm9, %vm341_vm10  ;;  %vm328_vm10 = vcmp.ge.s32.totalorder %v311_v50, %v1659_v24 }
 0x12b   :  { %v245_v40 = vsel %vm116_vm12, %v240_v36, 0  ;;  %1257 = vmatpush3.bf16.msra.mxu1 %v170_v39  ;;  %1258 = vmatprep.mubr.msk.bf16.mxu1 %vm1921_vm3, %v1579_v10  ;;  %vm342_vm12 = vcmp.lt.s32.totalorder %v308_v42, %v1662_v25  ;;  %v401_v36 = vmul.u32 16, %v1648_v3  ;;  %v1585_v39 = vmov 1.0  }
 0x12c   :  { %1263 = vmatpush3.bf16.msra.mxu0 %v245_v40  ;;  %1373 = vmatprep.subr.msk.bf16.mxu1 %vm1681_vm4, %v1583_v43  ;;  %vm358_vm15 = vmand %vm325_vm11, %vm342_vm12  ;;  %vm329_vm11 = vcmp.ge.s32.totalorder %v312_v51, %v1659_v24  ;;  %vm345_vm12 = vcmp.lt.s32.totalorder %v311_v50, %v1662_v25 }
 0x12d   :  { %vm1721_vm7 = vmpackc.low %vm358_vm15, %vm357_vm14  ;;  %vm346_vm14 = vcmp.lt.s32.totalorder %v312_v51, %v1662_v25  ;;  %1404 = vmatprep.subr.bf16.mxu0 %v1584_v21  ;;  %v403_v38 = vadd.s32 16, %v401_v36 }
 0x12e   :  { %vm361_vm15 = vmand %vm328_vm10, %vm345_vm12 }
 0x12f   :  { %1265 = vmatmul.mubr.msk.bf16.vlgmr.msra.gmra.mrb[0].mxu0 %vm112_vm0, %v1463_v41 }
 0x130   :  { %1307 = vmatprep.mubr.msk.f32.mxu0 %vm1921_vm3, %v1579_v10  ;;  %vm351_vm3 = vcmp.lt.s32.totalorder %v317_v58, %v1662_v25 }
 0x132   :  { %1259 = vmatmul.mubr.msk.bf16.vlgmr.msra.gmra.mrb[4].mxu1 %vm112_vm0, %v1464_v44  ;;  %vm359_vm0 = vmand %vm326_vm1, %vm343_vm2 }
 0x133   :  { %1375 = vmatpush3.bf16.msk.msra.mxu1 %vm1681_vm4, %v1583_v43  ;;  %vm1731_vm9 = vmpackc.low %vm360_vm8, %vm359_vm0  ;;  %vm347_vm0 = vcmp.lt.s32.totalorder %v313_v52, %v1662_v25  ;;  %vm348_vm8 = vcmp.lt.s32.totalorder %v314_v53, %v1662_v25 }
 0x134   :  { %1377 = vmatprep.subr.msk.bf16.mxu1 %vm1703_vm13, %v1583_v43  ;;  %vm362_vm1 = vmand %vm329_vm11, %vm346_vm14  ;;  %vm332_vm14 = vcmp.ge.s32.totalorder %v315_v55, %v1659_v24 }
 0x135   :  { %vm1752_vm2 = vmpackc.low %vm362_vm1, %vm361_vm15  ;;  %vm333_vm15 = vcmp.ge.s32.totalorder %v316_v56, %v1659_v24  ;;  %vm349_vm1 = vcmp.lt.s32.totalorder %v315_v55, %v1662_v25 }
 0x136   :  { %vm363_vm10 = vmand %vm330_vm5, %vm347_vm0  ;;  %vm350_vm5 = vcmp.lt.s32.totalorder %v316_v56, %v1662_v25 }
 0x137   :  { %1379 = vmatpush3.bf16.msk.msra.mxu1 %vm1703_vm13, %v1583_v43  ;;  %vm364_vm11 = vmand %vm331_vm6, %vm348_vm8 }
 0x138   :  { %1381 = vmatprep.subr.msk.bf16.mxu1 %vm1721_vm7, %v1583_v43  ;;  %vm1768_vm12 = vmpackc.low %vm364_vm11, %vm363_vm10  ;;  %vm334_vm10 = vcmp.ge.s32.totalorder %v317_v58, %v1659_v24  ;;  %vm335_vm11 = vcmp.ge.s32.totalorder %v318_v59, %v1659_v24 }
 0x139   :  { %vm365_vm6 = vmand %vm332_vm14, %vm349_vm1  ;;  %vm352_vm14 = vcmp.lt.s32.totalorder %v318_v59, %v1662_v25 }
 0x13a   :  { %vm366_vm0 = vmand %vm333_vm15, %vm350_vm5  ;;  %v293_v16 = vpop.permute.xlu0 %292  ;;  %v298_v19 = vpop.permute.xlu1 %297 }
 0x13b   :  { %1383 = vmatpush3.bf16.msk.msra.mxu1 %vm1721_vm7, %v1583_v43  ;;  %vm1784_vm8 = vmpackc.low %vm366_vm0, %vm365_vm6  ;;  %vm409_vm6 = vcmp.ge.s32.totalorder %v1646_v2, %v408_v22  ;;  %vm411_vm0 = vcmp.lt.s32.totalorder %v1646_v2, %v410_v23 }
 0x13c   :  { %1385 = vmatprep.subr.msk.bf16.mxu1 %vm1731_vm9, %v1583_v43  ;;  %vm367_vm15 = vmand %vm334_vm10, %vm351_vm3  ;;  %vm1940_vm3 = vmmov 0  }
 0x13d   :  { %vm368_vm1 = vmand %vm335_vm11, %vm352_vm14  ;;  %vm502_vm11 = vcmask 130048   ;;  %vm416_vm14 = vcmp.ge.s32.totalorder %v1648_v3, %v415_v29 }
 0x13e   :  { %vm1798_vm5 = vmpackc.low %vm368_vm1, %vm367_vm15  ;;  %vm419_vm15 = vcmp.lt.s32.totalorder %v1648_v3, %v418_v30  ;;  %v970_v53 = vpop.permute.xlu1 %969  ;;  %v975_v55 = vpop.permute.xlu0 %974 }
 0x13f   :  { %1387 = vmatpush3.bf16.msk.msra.mxu1 %vm1731_vm9, %v1583_v43  ;;  %v1939_v61 = vsel %vm1798_vm5, 4294967295, %v1938_v61  ;;  %vm412_vm10 = vmand %vm409_vm6, %vm411_vm0  ;;  %vm577_vm6 = vcmask 64512  }
 0x140   :  { %1389 = vmatprep.subr.msk.bf16.mxu1 %vm1752_vm2, %v1583_v43  ;;  %v1141_v28 = vsel %vm412_vm10, 1.0, %v1579_v10  ;;  %vm421_vm1 = vmand %vm416_vm14, %vm419_vm15  ;;  %vm402_vm10 = vcmp.ge.s32.totalorder %v1646_v2, %v401_v36  ;;  %vm404_vm14 = vcmp.lt.s32.totalorder %v1646_v2, %v403_v38 }
 0x141   :  { %v1142_v31 = vsel %vm421_vm1, 1.0, %v1579_v10  ;;  %vm1833_vm15 = vmand %vm402_vm10, %vm404_vm14 }
 0x143   :  { %1391 = vmatpush3.bf16.msk.msra.mxu1 %vm1752_vm2, %v1583_v43 }
 0x144   :  { %1393 = vmatprep.subr.msk.bf16.mxu1 %vm1768_vm12, %v1583_v43 }
 0x147   :  { %1395 = vmatpush3.bf16.msk.msra.mxu1 %vm1768_vm12, %v1583_v43 }
 0x148   :  { %1397 = vmatprep.subr.msk.bf16.mxu1 %vm1784_vm8, %v1583_v43 }
 0x14b   :  { %1399 = vmatpush3.bf16.msk.msra.mxu1 %vm1784_vm8, %v1583_v43 }
 0x14c   :  { %1401 = vmatprep.subr.msk.bf16.mxu1 %vm1798_vm5, %v1583_v43 }
 0x14f   :  { %1403 = vmatpush3.bf16.msk.msra.mxu1 %vm1798_vm5, %v1583_v43  ;;  %vm420_vm5 = vcmp.lt.s32.totalorder %v1665_v26, %v418_v30 }
 0x150   :  { %1439 = vmatprep.subr.bf16.mxu1 %v1584_v21 }
 0x1fd   :  { %v154_v62 = vpop.f32.mrb[0].mxu1 }
 0x1fe   :  { %v1254_v63 = vpop.f32.mrb[1].mxu1 }
 0x1ff   :  { %v157_v0 = vpop.f32.mrb[2].mxu1  ;;  %v1065_v63 = vpop.permute.xlu1 %1064 }
 0x200   :  { %v1255_v1 = vpop.f32.mrb[3].mxu1 }
 0x202   :  { %v281_v4 = vpop.f32.mrb[0].mxu0 }
 0x203   :  { %v1266_v5 = vpop.f32.mrb[1].mxu0 }
 0x204   :  { %v284_v6 = vpop.f32.mrb[2].mxu0 }
 0x205   :  { %v1267_v7 = vpop.f32.mrb[3].mxu0  ;;  %v206_v8 = vpop.f32.mrb[4].mxu1 }
 0x206   :  { %v207_v9 = vadd.f32 %v206_v8, %v154_v62  ;;  %v1260_v11 = vpop.f32.mrb[5].mxu1 }
 0x207   :  { %v209_v12 = vpop.f32.mrb[6].mxu1 }
 0x208   :  { %v288_v13 = vadd.f32 %v281_v4, %v207_v9  ;;  %v210_v14 = vadd.f32 %v209_v12, %v157_v0  ;;  %v1261_v15 = vpop.f32.mrb[7].mxu1 }
 0x20a   :  { %v289_v17 = vadd.f32 %v284_v6, %v210_v14  ;;  %v1808_v18 = vadd.f32 %v293_v16, %v288_v13 }
 0x20c   :  { %v1810_v20 = vadd.f32 %v298_v19, %v289_v17  ;;  %1300 = vmatprep.mubr.f32.mxu1 %v1808_v18 }
 0x20e   :  { %1301 = vmatmul.mubr.f32.vlgmr.msra.gmra.mrb[8].mxu1 %v1810_v20 }
 0x20f   :  { %1359 = vmatprep.mubr.msk.f32.mxu1 %vm1940_vm3, %v1579_v10  ;;  %vm417_vm3 = vcmp.ge.s32.totalorder %v1665_v26, %v415_v29 }
 0x210   :  { %vm422_vm0 = vmand %vm417_vm3, %vm420_vm5 }
 0x211   :  { %v1143_v35 = vsel %vm422_vm0, 1.0, %v1579_v10 }
 0x2e1   :  { %v1302_v24 = vpop.f32.mrb[8].mxu1 }
 0x2e2   :  { %v493_v25 = vpop.f32.mrb[9].mxu1 }
 0x2e3   :  { %v1405_v27 = vpack.c.bf16 %v1302_v24, %v493_v25 }
 0x2e5   :  { %1406 = vmatpush3.bf16.msra.mxu0 %v1405_v27 }
 0x2e8   :  { %1308 = vmatmul.mubr.msk.f32.vlgmr.msra.gmra.mrb[4].mxu0 %vm502_vm11, %v1141_v28 }
 0x2e9   :  { %1312 = vmatprep.mubr.msk.f32.mxu0 %vm577_vm6, %v1142_v31 }
 0x3bb   :  { %v572_v32 = vpop.f32.mrb[4].mxu0 }
 0x3bc   :  { %v576_v33 = vmul.f32 0.03125, %v572_v32  ;;  %v1309_v34 = vpop.f32.mrb[5].mxu0 }
 0x3be   :  { %1310 = vmatprep.subr.mxu0 %v576_v33 }
 0x3bf   :  { %1311 = vmatpush3.msra.mxu0 %v576_v33 }
 0x3c0   :  { %1313 = vmatmul.mubr.msk.f32.vlgmr.msra.gmra.mrb[6].mxu0 %vm577_vm6, %v1143_v35  ;;  %1315 = vmatprep.subr.msk.mxu0 %vm1833_vm15, %v1585_v39 }
 0x3c1   :  { %1316 = vmatpush3.msk.msra.mxu0 %vm1833_vm15, %v1585_v39 }
 0x3c2   :  { %1408 = vmatprep.subr.msk.bf16.mxu0 %vm1681_vm4, %v1583_v43 }
 0x493   :  { %v1314_v3 = vpop.f32.mrb[6].mxu0 }
 0x494   :  { %v650_v10 = vpop.f32.mrb[7].mxu0 }
 0x495   :  { %1317 = vmatprep.mubr.msk.f32.mxu0 %vm577_vm6, %v650_v10 }
 0x496   :  { %1318 = vmatmul.mubr.msk.f32.vlgmr.msra.gmra.mrb[8].mxu0 %vm577_vm6, %v1314_v3 }
 0x497   :  { %1410 = vmatpush3.bf16.msk.msra.mxu0 %vm1681_vm4, %v1583_v43  ;;  %vm1943_vm4 = vnez %v1939_v61  ;;  %v1070_v61 = vpop.permute.xlu0 %1069 }
 0x498   :  { %1412 = vmatprep.subr.msk.bf16.mxu0 %vm1703_vm13, %v1583_v43 }
 0x49b   :  { %1414 = vmatpush3.bf16.msk.msra.mxu0 %vm1703_vm13, %v1583_v43 }
 0x49c   :  { %1416 = vmatprep.subr.msk.bf16.mxu0 %vm1721_vm7, %v1583_v43 }
 0x49f   :  { %1418 = vmatpush3.bf16.msk.msra.mxu0 %vm1721_vm7, %v1583_v43 }
 0x4a0   :  { %1420 = vmatprep.subr.msk.bf16.mxu0 %vm1731_vm9, %v1583_v43 }
 0x4a3   :  { %1422 = vmatpush3.bf16.msk.msra.mxu0 %vm1731_vm9, %v1583_v43 }
 0x4a4   :  { %1424 = vmatprep.subr.msk.bf16.mxu0 %vm1752_vm2, %v1583_v43 }
 0x4a7   :  { %1426 = vmatpush3.bf16.msk.msra.mxu0 %vm1752_vm2, %v1583_v43 }
 0x4a8   :  { %1428 = vmatprep.subr.msk.bf16.mxu0 %vm1768_vm12, %v1583_v43 }
 0x4ab   :  { %1430 = vmatpush3.bf16.msk.msra.mxu0 %vm1768_vm12, %v1583_v43 }
 0x4ac   :  { %1432 = vmatprep.subr.msk.bf16.mxu0 %vm1784_vm8, %v1583_v43 }
 0x4af   :  { %1434 = vmatpush3.bf16.msk.msra.mxu0 %vm1784_vm8, %v1583_v43 }
 0x4b0   :  { %1436 = vmatprep.subr.msk.bf16.mxu0 %vm1943_vm4, %v1583_v43 }
 0x4b3   :  { %1438 = vmatpush3.bf16.msk.msra.mxu0 %vm1943_vm4, %v1583_v43 }
 0x569   :  { %v1319_v2 = vpop.f32.mrb[8].mxu0 }
 0x56a   :  { %v741_v37 = vsub.f32 %v1810_v20, %v1319_v2  ;;  %v731_v40 = vpop.f32.mrb[9].mxu0 }
 0x56b   :  { %v740_v41 = vsub.f32 %v1808_v18, %v731_v40 }
 0x56c   :  { %v743_v44 = vmul.f32 %v741_v37, %v741_v37 }
 0x56d   :  { %v742_v42 = vmul.f32 %v740_v41, %v740_v41 }
 0x56f   :  { %1352 = vmatprep.mubr.f32.mxu0 %v742_v42 }
 0x570   :  { %1353 = vmatmul.mubr.f32.vlgmr.msra.gmra.mrb[10].mxu0 %v743_v44 }
 0x643   :  { %v1354_v45 = vpop.f32.mrb[10].mxu0 }
 0x644   :  { %v810_v46 = vpop.f32.mrb[11].mxu0 }
 0x645   :  { %v1440_v47 = vpack.c.bf16 %v1354_v45, %v810_v46 }
 0x647   :  { %1441 = vmatpush3.bf16.msra.mxu1 %v1440_v47 }
 0x64a   :  { %1360 = vmatmul.mubr.msk.f32.vlgmr.msra.gmra.mrb[10].mxu1 %vm502_vm11, %v1141_v28 }
 0x64b   :  { %1364 = vmatprep.mubr.msk.f32.mxu1 %vm577_vm6, %v1142_v31 }
 0x71d   :  { %v885_v48 = vpop.f32.mrb[10].mxu1 }
 0x71e   :  { %v889_v43 = vmul.f32 0.03125, %v885_v48  ;;  %v1361_v49 = vpop.f32.mrb[11].mxu1 }
 0x720   :  { %v890_v50 = vadd.f32 1e-05, %v889_v43 }
 0x722   :  { %1465 = vrsqrt.f32 %v890_v50 }
 0x72c   :  { %v1466_v51 = vpop.eup %1465 }
 0x72d   :  { %1362 = vmatprep.subr.mxu1 %v1466_v51 }
 0x72e   :  { %1363 = vmatpush3.msra.mxu1 %v1466_v51 }
 0x72f   :  { %1365 = vmatmul.mubr.msk.f32.vlgmr.msra.gmra.mrb[12].mxu1 %vm577_vm6, %v1143_v35  ;;  %1367 = vmatprep.subr.msk.mxu1 %vm1833_vm15, %v1585_v39 }
 0x730   :  { %1368 = vmatpush3.msk.msra.mxu1 %vm1833_vm15, %v1585_v39 }
 0x802   :  { %v1366_v52 = vpop.f32.mrb[12].mxu1 }
 0x803   :  { %v958_v54 = vpop.f32.mrb[13].mxu1  ;;  %v978_v57 = vmul.f32 %v1366_v52, %v975_v55 }
 0x804   :  { %v977_v56 = vmul.f32 %v970_v53, %v958_v54 }
 0x806   :  { %1369 = vmatprep.mubr.msk.f32.mxu1 %vm577_vm6, %v977_v56 }
 0x807   :  { %1370 = vmatmul.mubr.msk.f32.vlgmr.msra.gmra.mrb[14].mxu1 %vm577_vm6, %v978_v57 }
 0x8da   :  { %v1371_v58 = vpop.f32.mrb[14].mxu1 }
 0x8db   :  { %v1061_v59 = vmul.f32 %v1371_v58, %v741_v37  ;;  %v1051_v60 = vpop.f32.mrb[15].mxu1 }
 0x8dc   :  { %v1060_v62 = vmul.f32 %v1051_v60, %v740_v41 }
 0x8dd   :  { %v1073_v0 = vadd.f32 %v1070_v61, %v1061_v59 }
 0x8de   :  { %v1072_v1 = vadd.f32 %v1065_v63, %v1060_v62 }
 0x8df   :  { %v1075_v4 = vmin.f32 %v1073_v0, 20.0  ;;  %vm1093_vm13 = vcmp.gt.f32.partialorder %v1073_v0, 20.0 }
 0x8e0   :  { %v1074_v5 = vmin.f32 %v1072_v1, 20.0  ;;  %vm1092_vm7 = vcmp.gt.f32.partialorder %v1072_v1, 20.0 }
 0x8e1   :  { %v1078_v6 = vmul.f32 1.442695, %v1075_v4 }
 0x8e2   :  { %v1076_v7 = vmul.f32 1.442695, %v1074_v5 }
 0x8e3   :  { %1467 = vpow2.f32 %v1078_v6 }
 0x8e4   :  { %1469 = vpow2.f32 %v1076_v7 }
 0x8ed   :  { %v1468_v8 = vpop.eup %1467 }
 0x8ee   :  { %v1470_v9 = vpop.eup %1469  ;;  %v1081_v11 = vadd.f32 1.0, %v1468_v8 }
 0x8ef   :  { %v1080_v12 = vadd.f32 1.0, %v1470_v9 }
 0x8f0   :  { %v1083_v13 = vmul.f32 %v1081_v11, %v1081_v11 }
 0x8f1   :  { %v1082_v14 = vmul.f32 %v1080_v12, %v1080_v12 }
 0x8f2   :  { %v1087_v15 = vadd.f32 1.0, %v1083_v13  ;;  %v1189_v17 = vadd.f32 -1.0, %v1083_v13 }
 0x8f3   :  { %v1086_v16 = vadd.f32 1.0, %v1082_v14  ;;  %v1188_v19 = vadd.f32 -1.0, %v1082_v14 }
 0x8f4   :  { %1471 = vrcp.f32 %v1087_v15 }
 0x8f5   :  { %1473 = vrcp.f32 %v1086_v16 }
 0x8fe   :  { %v1472_v18 = vpop.eup %1471 }
 0x8ff   :  { %v1474_v20 = vpop.eup %1473  ;;  %v1091_v21 = vmul.f32 %v1472_v18, %v1189_v17 }
 0x900   :  { %v1090_v22 = vmul.f32 %v1474_v20, %v1188_v19 }
 0x901   :  { %v1095_v23 = vmul.f32 %v1091_v21, %v1073_v0 }
 0x902   :  { %v1094_v24 = vmul.f32 %v1090_v22, %v1072_v1 }
 0x903   :  { %v1097_v25 = vsel %vm1093_vm13, %v1073_v0, %v1095_v23 }
 0x904   :  { %v1096_v27 = vsel %vm1092_vm7, %v1072_v1, %v1094_v24  ;;  %1099 = vst [vmem:[#allocation8 + $0x8] sm:$0xff] %v1097_v25 }
 0x905   :  { %1098 = vst [vmem:[#allocation8] sm:$0xff] %v1096_v27 }
 0x906   :  { %1552 = shalt.err (!%p1549_p0)
}
 0x907   :  { %s1553_s4 = scalar_lea.hbm %s1920_s3, 256 }
 0x908   :  { %p1554_p1 = scmp.ne.s32.totalorder %s1920_s3, %s1553_s4  ;;  %p1557_p2 = scmp.lt.u32.totalorder %s1553_s4, %s1920_s3 }
 0x90a   :  { %p1559_p3 = pnand %p1557_p2, %p1554_p1 }
 0x90c   :  { %1562 = shalt.err (!%p1559_p3)
}
 0x90d   :  { %1111 = dma.vmem_to_hbm [thread:$0]  %s1106_s27, 256, %s1920_s3, [#allocation4], %s1574_s0, %s1574_s0, %s1575_s20  }
 0x90e   :  { %1567 = dma.done.wait [#allocation4], 256  }
 0x90f   :  { %1568 = vsyncadd [#allocation4], 4294967040 }
 0x910   :  { %1115 = vsyncpa [#allocation3], 1 }
 0x911   :  { %1116 = vsyncpa [#allocation6], 1 }
 0x912   :  { %1117 = vsyncpa [#allocation4], 1 }

</bundles_post_ra>
